<compile_context>
chip_gen: v7x
topology: tpu7x:2x2x1
jax: 0.10.0
libtpu: 0.0.40
codegen_flags: <defaults>
</compile_context>

<pallas_src>
import jax
import jax.numpy as jnp
from jax.experimental import pallas as pl
from jax.experimental.pallas import tpu as pltpu

LN_EPS = 1e-5  # torch.nn.LayerNorm default


def _layer_norm(y, g, b):
    # Two-pass variance (same form as torch.nn.LayerNorm).
    mu = jnp.mean(y, axis=-1, keepdims=True)
    d = y - mu
    var = jnp.mean(d * d, axis=-1, keepdims=True)
    return d * jax.lax.rsqrt(var + LN_EPS) * g + b


# ---------------------------------------------------------------------------
# Kernel
# ---------------------------------------------------------------------------
def lngru2d_cell_kernel(x_ref, s_ref, wi_t_ref, ws_t_ref, ln4_ref, lnh_ref,
                        h_ref):
    D = h_ref.shape[-1]
    mxu_dtype = wi_t_ref.dtype

    # MXU matmuls in the weights' dtype (bf16 by default), f32 accumulation.
    s = s_ref[...]
    wi_out = jnp.dot(x_ref[...].astype(mxu_dtype), wi_t_ref[...],
                     preferred_element_type=jnp.float32)
    ws_out = jnp.dot(s.astype(mxu_dtype), ws_t_ref[...],
                     preferred_element_type=jnp.float32)

    # LN / gate math in f32 (no bf16 VPU/EUP on v5e).
    ln4 = ln4_ref[...].astype(jnp.float32)   # rows: [LNi_g, LNi_b, LNs_g, LNs_b]
    igates = _layer_norm(wi_out, ln4[0:1, :], ln4[1:2, :])
    sgates = _layer_norm(ws_out, ln4[2:3, :], ln4[3:4, :])

    # Gate layout after the prepare_params column reorder: [r_inv, i, l, n].
    s_n = sgates[:, 3 * D:]            # pulled out first so sgates dies early
    gates = igates + sgates

    # Sigmoid only over the contiguous [r, i, l] slab (n chunk skips the EUP).
    sig = jax.nn.sigmoid(gates[:, :3 * D])
    r_inv = sig[:, 0 * D:1 * D]
    i_g = sig[:, 1 * D:2 * D]
    l_g = sig[:, 2 * D:3 * D]
    n = jnp.tanh(gates[:, 3 * D:] - r_inv * s_n)

    s0 = s[:, :D].astype(jnp.float32)
    s1 = s[:, D:].astype(jnp.float32)
    # l*s0 + (1-l)*s1 == s1 + l*(s0 - s1)
    h = n + i_g * (s1 + l_g * (s0 - s1) - n)

    lnh = lnh_ref[...].astype(jnp.float32)   # rows: [LNh_g, LNh_b]
    h = _layer_norm(h, lnh[0:1, :], lnh[1:2, :])
    h_ref[...] = h.astype(h_ref.dtype)


# ---------------------------------------------------------------------------
# One-time parameter packing (off the hot path)
# ---------------------------------------------------------------------------
def prepare_params(params, dtype=jnp.bfloat16):
    """Transpose weights to (in, 4D), reorder gate columns [r,i,n,l] -> [r,i,l,n],
    cast weights to `dtype` (bf16 default), pack LN gamma/beta."""
    D4, _ = params["Wi"].shape
    D = D4 // 4
    # new column k <- old column perm[k]
    perm = jnp.concatenate([
        jnp.arange(0, 2 * D),            # r, i
        jnp.arange(3 * D, 4 * D),        # l
        jnp.arange(2 * D, 3 * D),        # n
    ])
    wi = jnp.asarray(params["Wi"], jnp.float32)[perm]   # (4D, input_dim)
    ws = jnp.asarray(params["Ws"], jnp.float32)[perm]   # (4D, 2D)
    wi_t = wi.T                                          # (input_dim, 4D)
    ws_t = ws.T                                          # (2D, 4D)
    if dtype is not None:
        wi_t = wi_t.astype(dtype)
        ws_t = ws_t.astype(dtype)
    ln4 = jnp.stack([
        jnp.asarray(params["LNi_g"])[perm],
        jnp.asarray(params["LNi_b"])[perm],
        jnp.asarray(params["LNs_g"])[perm],
        jnp.asarray(params["LNs_b"])[perm],
    ], axis=0).astype(jnp.float32)                       # (4, 4D)
    lnh = jnp.stack([params["LNh_g"], params["LNh_b"]],
                    axis=0).astype(jnp.float32)          # (2, D)
    return {"Wi_t": wi_t, "Ws_t": ws_t, "LN4": ln4, "LNh": lnh}


# ---------------------------------------------------------------------------
# Wrapper
# ---------------------------------------------------------------------------
def _round_up(v, m):
    return (v + m - 1) // m * m


def _pick_tb(b_pad, d):
    """Batch tile: <=256, multiple of 8, VMEM- and megacore-aware."""
    cap = 256
    # Keep ~6 live (tb, 4D) f32 intermediates under ~24 MiB (v7x per-TC VMEM).
    cap = min(cap, max(8, ((24 << 20) // (96 * max(d, 1))) // 8 * 8))
    # Give the "parallel" batch axis >= 2 grid steps so v7x's 2 TCs share work.
    if b_pad >= 16:
        cap = min(cap, _round_up(pl.cdiv(b_pad, 2), 8))
    return min(cap, b_pad)


def _vmem_limit(tb, input_dim, d, act_itemsize, w_itemsize):
    # Budget: weights (x2 worst-case buffering) + LN params + double-buffered
    # IO tiles + f32 gate intermediates, 1.5x headroom; clamp to [32, 64] MiB.
    w_bytes = (input_dim + 2 * d) * 4 * d * w_itemsize * 2
    ln_bytes = (4 * 4 * d + 2 * d) * 4 * 2
    io_bytes = (tb * (input_dim + 2 * d) + tb * d) * act_itemsize * 2
    gate_bytes = 8 * tb * 4 * d * 4
    est = int(1.5 * (w_bytes + ln_bytes + io_bytes + gate_bytes)) + (2 << 20)
    return max(32 << 20, min(est, 64 << 20))


def _batch_map(i):
    return (i, 0)


def _const_map(i):
    return (0, 0)


def lngru2d_cell(x, s_prev0, s_prev1, prep, *, block_b=None,
                 vmem_limit_bytes=None):
    """x: (B, input_dim), s_prev*: (B, D), prep from prepare_params."""
    B, input_dim = x.shape
    D = s_prev0.shape[-1]

    b8 = _round_up(B, 8)
    tb = _pick_tb(b8, D) if block_b is None else block_b
    tb = max(8, _round_up(min(tb, b8), 8))
    b_pad = _round_up(B, tb)            # pad batch so tb divides it exactly

    # Single (B, 2D) state operand -> one longer-K Ws matmul in the kernel.
    s = jnp.concatenate([s_prev0, s_prev1], axis=-1)
    if b_pad != B:
        pad = ((0, b_pad - B), (0, 0))
        x = jnp.pad(x, pad)
        s = jnp.pad(s, pad)

    grid = (b_pad // tb,)
    if vmem_limit_bytes is None:
        vmem_limit_bytes = _vmem_limit(tb, input_dim, D, x.dtype.itemsize,
                                       prep["Wi_t"].dtype.itemsize)

    def call(single_buffer_weights):
        wkw = ({"pipeline_mode": pl.Buffered(1)}
               if single_buffer_weights else {})
        in_specs = [
            pl.BlockSpec((tb, input_dim), _batch_map),            # x
            pl.BlockSpec((tb, 2 * D), _batch_map),                # [s0, s1]
            pl.BlockSpec(prep["Wi_t"].shape, _const_map, **wkw),  # Wi^T (resident)
            pl.BlockSpec(prep["Ws_t"].shape, _const_map, **wkw),  # Ws^T (resident)
            pl.BlockSpec(prep["LN4"].shape, _const_map, **wkw),   # LNi/LNs g+b
            pl.BlockSpec(prep["LNh"].shape, _const_map, **wkw),   # LNh g+b
        ]
        out_spec = pl.BlockSpec((tb, D), _batch_map)
        return pl.pallas_call(
            lngru2d_cell_kernel,
            out_shape=jax.ShapeDtypeStruct((b_pad, D), s_prev0.dtype),
            grid=grid,
            in_specs=in_specs,
            out_specs=out_spec,
            compiler_params=pltpu.CompilerParams(
                dimension_semantics=("parallel",),
                vmem_limit_bytes=vmem_limit_bytes),
        )(x, s, prep["Wi_t"], prep["Ws_t"], prep["LN4"], prep["LNh"])

    try:
        h = call(single_buffer_weights=True)
    except Exception:
        # Fallback if this jax version rejects Buffered(1): default buffering.
        h = call(single_buffer_weights=False)
    return h[:B] if b_pad != B else h


# ---------------------------------------------------------------------------
# Pure-JAX reference (mirrors the PyTorch forward, original gate order)
# ---------------------------------------------------------------------------
def lngru2d_cell_ref(x, s_prev0, s_prev1, params):
    D = s_prev0.shape[-1]
    s = jnp.concatenate([s_prev0, s_prev1], axis=-1)
    igates = _layer_norm(x @ params["Wi"].T, params["LNi_g"], params["LNi_b"])
    sgates = _layer_norm(s @ params["Ws"].T, params["LNs_g"], params["LNs_b"])
    gates = igates + sgates
    r_inv, i_g, n_pre, l_g = jnp.split(gates, 4, axis=1)
    s_n = sgates[:, 2 * D:3 * D]
    l_g = jax.nn.sigmoid(l_g)
    r_inv = jax.nn.sigmoid(r_inv)
    i_g = jax.nn.sigmoid(i_g)
    n = jnp.tanh(n_pre - r_inv * s_n)
    h = n + i_g * (l_g * s_prev0 + (1.0 - l_g) * s_prev1 - n)
    return _layer_norm(h, params["LNh_g"], params["LNh_b"])


def init_params(key, input_dim, state_dim):
    k1, k2, k3, k4 = jax.random.split(key, 4)
    D4 = state_dim * 4
    bi = 1.0 / jnp.sqrt(input_dim)
    bs = 1.0 / jnp.sqrt(2 * state_dim)
    return {
        "Wi": jax.random.uniform(k1, (D4, input_dim), jnp.float32, -bi, bi),
        "Ws": jax.random.uniform(k2, (D4, 2 * state_dim), jnp.float32, -bs, bs),
        "LNi_g": 1.0 + 0.01 * jax.random.normal(k3, (D4,), jnp.float32),
        "LNi_b": jnp.zeros((D4,), jnp.float32),
        "LNs_g": jnp.ones((D4,), jnp.float32),
        "LNs_b": 0.01 * jax.random.normal(k4, (D4,), jnp.float32),
        "LNh_g": jnp.ones((state_dim,), jnp.float32),
        "LNh_b": jnp.zeros((state_dim,), jnp.float32),
    }


if __name__ == "__main__":
    B, INPUT_DIM, STATE_DIM = 8, 16, 32

    key = jax.random.PRNGKey(0)
    kx, ks0, ks1, kp = jax.random.split(key, 4)

    x = jax.random.normal(kx, (B, INPUT_DIM), jnp.float32)
    s_prev0 = jax.random.normal(ks0, (B, STATE_DIM), jnp.float32)
    s_prev1 = jax.random.normal(ks1, (B, STATE_DIM), jnp.float32)
    params = init_params(kp, INPUT_DIM, STATE_DIM)

    h_ref = lngru2d_cell_ref(x, s_prev0, s_prev1, params)

    # 1) f32-weight run: tight check of the kernel math vs. the reference.
    prep_f32 = prepare_params(params, dtype=jnp.float32)
    h_f32 = jax.block_until_ready(lngru2d_cell(x, s_prev0, s_prev1, prep_f32))
    assert h_f32.shape == (B, STATE_DIM)
    assert jnp.allclose(h_f32, h_ref, atol=1e-4, rtol=1e-4), \
        "f32 kernel mismatch vs reference"

    # 2) default bf16-weight run (production path): looser tolerance is the
    #    expected consequence of bf16 weights/matmul inputs, not a bug.
    prep_bf16 = prepare_params(params)          # bf16 weights by default
    h_bf16 = jax.block_until_ready(lngru2d_cell(x, s_prev0, s_prev1, prep_bf16))
    assert h_bf16.shape == (B, STATE_DIM)
    assert jnp.allclose(h_bf16, h_ref, atol=1e-1, rtol=1e-1), \
        "bf16 kernel mismatch vs reference"

    print("KERNEL_OK")
</pallas_src>

<mosaic_0001>
module attributes {stable_mosaic.version = 11 : i64} {
  func.func @lngru2d_cell_kernel(%arg0: i32, %arg1: memref<8x16xf32, #tpu.memory_space<vmem>>, %arg2: memref<8x64xf32, #tpu.memory_space<vmem>>, %arg3: memref<16x128xf32, #tpu.memory_space<vmem>>, %arg4: memref<64x128xf32, #tpu.memory_space<vmem>>, %arg5: memref<4x128xf32, #tpu.memory_space<vmem>>, %arg6: memref<2x32xf32, #tpu.memory_space<vmem>>, %arg7: memref<8x32xf32, #tpu.memory_space<vmem>>) attributes {dimension_semantics = [#tpu.dimension_semantics<parallel>], iteration_bounds = array<i64: 1>, scalar_prefetch = 0 : i64, scratch_operands = 0 : i64, tpu.core_type = #tpu.core_type<tc>, window_params = [{transform_indices = @transform_0, window_bounds = array<i64: 8, 16>}, {transform_indices = @transform_1, window_bounds = array<i64: 8, 64>}, {pipeline_mode = #tpu.pipeline_mode<synchronous>, transform_indices = @transform_2, window_bounds = array<i64: 16, 128>}, {pipeline_mode = #tpu.pipeline_mode<synchronous>, transform_indices = @transform_3, window_bounds = array<i64: 64, 128>}, {pipeline_mode = #tpu.pipeline_mode<synchronous>, transform_indices = @transform_4, window_bounds = array<i64: 4, 128>}, {pipeline_mode = #tpu.pipeline_mode<synchronous>, transform_indices = @transform_5, window_bounds = array<i64: 2, 32>}, {transform_indices = @transform_6, window_bounds = array<i64: 8, 32>}]} {
    %c0 = arith.constant 0 : index
    %c0_0 = arith.constant 0 : index
    %0 = vector.load %arg2[%c0, %c0_0] : memref<8x64xf32, #tpu.memory_space<vmem>>, vector<8x64xf32>
    %c0_1 = arith.constant 0 : index
    %c0_2 = arith.constant 0 : index
    %1 = vector.load %arg1[%c0_1, %c0_2] : memref<8x16xf32, #tpu.memory_space<vmem>>, vector<8x16xf32>
    %c0_3 = arith.constant 0 : index
    %c0_4 = arith.constant 0 : index
    %2 = vector.load %arg3[%c0_3, %c0_4] : memref<16x128xf32, #tpu.memory_space<vmem>>, vector<16x128xf32>
    %cst = arith.constant dense<0.000000e+00> : vector<8x128xf32>
    %3 = tpu.matmul %1, %2, %cst {dimension_numbers = #tpu.dot_dimension_numbers<[1], [0], [0], [1], [0, 0, 1, 1], [], []>} : vector<8x16xf32>, vector<16x128xf32>, vector<8x128xf32> -> vector<8x128xf32>
    %c0_5 = arith.constant 0 : index
    %c0_6 = arith.constant 0 : index
    %4 = vector.load %arg4[%c0_5, %c0_6] : memref<64x128xf32, #tpu.memory_space<vmem>>, vector<64x128xf32>
    %cst_7 = arith.constant dense<0.000000e+00> : vector<8x128xf32>
    %5 = tpu.matmul %0, %4, %cst_7 {dimension_numbers = #tpu.dot_dimension_numbers<[1], [0], [0], [1], [0, 0, 1, 1], [], []>} : vector<8x64xf32>, vector<64x128xf32>, vector<8x128xf32> -> vector<8x128xf32>
    %c0_8 = arith.constant 0 : index
    %c0_9 = arith.constant 0 : index
    %6 = vector.load %arg5[%c0_8, %c0_9] : memref<4x128xf32, #tpu.memory_space<vmem>>, vector<4x128xf32>
    %7 = vector.extract_strided_slice %6 {offsets = [0, 0], sizes = [1, 128], strides = [1, 1]} : vector<4x128xf32> to vector<1x128xf32>
    %8 = vector.extract_strided_slice %6 {offsets = [1, 0], sizes = [1, 128], strides = [1, 1]} : vector<4x128xf32> to vector<1x128xf32>
    %cst_10 = arith.constant dense<0.000000e+00> : vector<8xf32>
    %9 = vector.multi_reduction <add>, %3, %cst_10 [1] : vector<8x128xf32> to vector<8xf32>
    %10 = vector.shape_cast %9 : vector<8xf32> to vector<8x1xf32>
    %cst_11 = arith.constant 1.280000e+02 : f32
    %11 = vector.broadcast %cst_11 : f32 to vector<8x1xf32>
    %12 = arith.divf %10, %11 : vector<8x1xf32>
    %13 = vector.broadcast %12 : vector<8x1xf32> to vector<8x128xf32>
    %14 = arith.subf %3, %13 : vector<8x128xf32>
    %15 = arith.mulf %14, %14 : vector<8x128xf32>
    %cst_12 = arith.constant dense<0.000000e+00> : vector<8xf32>
    %16 = vector.multi_reduction <add>, %15, %cst_12 [1] : vector<8x128xf32> to vector<8xf32>
    %17 = vector.shape_cast %16 : vector<8xf32> to vector<8x1xf32>
    %cst_13 = arith.constant 1.280000e+02 : f32
    %18 = vector.broadcast %cst_13 : f32 to vector<8x1xf32>
    %19 = arith.divf %17, %18 : vector<8x1xf32>
    %cst_14 = arith.constant 9.99999974E-6 : f32
    %20 = vector.broadcast %cst_14 : f32 to vector<8x1xf32>
    %21 = arith.addf %19, %20 : vector<8x1xf32>
    %22 = math.rsqrt %21 : vector<8x1xf32>
    %23 = vector.broadcast %22 : vector<8x1xf32> to vector<8x128xf32>
    %24 = arith.mulf %14, %23 : vector<8x128xf32>
    %25 = vector.broadcast %7 : vector<1x128xf32> to vector<8x128xf32>
    %26 = arith.mulf %24, %25 : vector<8x128xf32>
    %27 = vector.broadcast %8 : vector<1x128xf32> to vector<8x128xf32>
    %28 = arith.addf %26, %27 : vector<8x128xf32>
    %29 = vector.extract_strided_slice %6 {offsets = [2, 0], sizes = [1, 128], strides = [1, 1]} : vector<4x128xf32> to vector<1x128xf32>
    %30 = vector.extract_strided_slice %6 {offsets = [3, 0], sizes = [1, 128], strides = [1, 1]} : vector<4x128xf32> to vector<1x128xf32>
    %cst_15 = arith.constant dense<0.000000e+00> : vector<8xf32>
    %31 = vector.multi_reduction <add>, %5, %cst_15 [1] : vector<8x128xf32> to vector<8xf32>
    %32 = vector.shape_cast %31 : vector<8xf32> to vector<8x1xf32>
    %cst_16 = arith.constant 1.280000e+02 : f32
    %33 = vector.broadcast %cst_16 : f32 to vector<8x1xf32>
    %34 = arith.divf %32, %33 : vector<8x1xf32>
    %35 = vector.broadcast %34 : vector<8x1xf32> to vector<8x128xf32>
    %36 = arith.subf %5, %35 : vector<8x128xf32>
    %37 = arith.mulf %36, %36 : vector<8x128xf32>
    %cst_17 = arith.constant dense<0.000000e+00> : vector<8xf32>
    %38 = vector.multi_reduction <add>, %37, %cst_17 [1] : vector<8x128xf32> to vector<8xf32>
    %39 = vector.shape_cast %38 : vector<8xf32> to vector<8x1xf32>
    %cst_18 = arith.constant 1.280000e+02 : f32
    %40 = vector.broadcast %cst_18 : f32 to vector<8x1xf32>
    %41 = arith.divf %39, %40 : vector<8x1xf32>
    %cst_19 = arith.constant 9.99999974E-6 : f32
    %42 = vector.broadcast %cst_19 : f32 to vector<8x1xf32>
    %43 = arith.addf %41, %42 : vector<8x1xf32>
    %44 = math.rsqrt %43 : vector<8x1xf32>
    %45 = vector.broadcast %44 : vector<8x1xf32> to vector<8x128xf32>
    %46 = arith.mulf %36, %45 : vector<8x128xf32>
    %47 = vector.broadcast %29 : vector<1x128xf32> to vector<8x128xf32>
    %48 = arith.mulf %46, %47 : vector<8x128xf32>
    %49 = vector.broadcast %30 : vector<1x128xf32> to vector<8x128xf32>
    %50 = arith.addf %48, %49 : vector<8x128xf32>
    %51 = vector.extract_strided_slice %50 {offsets = [0, 96], sizes = [8, 32], strides = [1, 1]} : vector<8x128xf32> to vector<8x32xf32>
    %52 = arith.addf %28, %50 : vector<8x128xf32>
    %53 = vector.extract_strided_slice %52 {offsets = [0, 0], sizes = [8, 96], strides = [1, 1]} : vector<8x128xf32> to vector<8x96xf32>
    %54 = arith.negf %53 : vector<8x96xf32>
    %55 = math.exp %54 : vector<8x96xf32>
    %cst_20 = arith.constant 1.000000e+00 : f32
    %56 = vector.broadcast %cst_20 : f32 to vector<8x96xf32>
    %57 = arith.addf %56, %55 : vector<8x96xf32>
    %58 = arith.divf %56, %57 : vector<8x96xf32>
    %59 = vector.extract_strided_slice %58 {offsets = [0, 0], sizes = [8, 32], strides = [1, 1]} : vector<8x96xf32> to vector<8x32xf32>
    %60 = vector.extract_strided_slice %58 {offsets = [0, 32], sizes = [8, 32], strides = [1, 1]} : vector<8x96xf32> to vector<8x32xf32>
    %61 = vector.extract_strided_slice %58 {offsets = [0, 64], sizes = [8, 32], strides = [1, 1]} : vector<8x96xf32> to vector<8x32xf32>
    %62 = vector.extract_strided_slice %52 {offsets = [0, 96], sizes = [8, 32], strides = [1, 1]} : vector<8x128xf32> to vector<8x32xf32>
    %63 = arith.mulf %59, %51 : vector<8x32xf32>
    %64 = arith.subf %62, %63 : vector<8x32xf32>
    %65 = math.tanh %64 : vector<8x32xf32>
    %66 = vector.extract_strided_slice %0 {offsets = [0, 0], sizes = [8, 32], strides = [1, 1]} : vector<8x64xf32> to vector<8x32xf32>
    %67 = vector.extract_strided_slice %0 {offsets = [0, 32], sizes = [8, 32], strides = [1, 1]} : vector<8x64xf32> to vector<8x32xf32>
    %68 = arith.subf %66, %67 : vector<8x32xf32>
    %69 = arith.mulf %61, %68 : vector<8x32xf32>
    %70 = arith.addf %67, %69 : vector<8x32xf32>
    %71 = arith.subf %70, %65 : vector<8x32xf32>
    %72 = arith.mulf %60, %71 : vector<8x32xf32>
    %73 = arith.addf %65, %72 : vector<8x32xf32>
    %c0_21 = arith.constant 0 : index
    %c0_22 = arith.constant 0 : index
    %74 = vector.load %arg6[%c0_21, %c0_22] : memref<2x32xf32, #tpu.memory_space<vmem>>, vector<2x32xf32>
    %75 = vector.extract_strided_slice %74 {offsets = [0, 0], sizes = [1, 32], strides = [1, 1]} : vector<2x32xf32> to vector<1x32xf32>
    %76 = vector.extract_strided_slice %74 {offsets = [1, 0], sizes = [1, 32], strides = [1, 1]} : vector<2x32xf32> to vector<1x32xf32>
    %cst_23 = arith.constant dense<0.000000e+00> : vector<8xf32>
    %77 = vector.multi_reduction <add>, %73, %cst_23 [1] : vector<8x32xf32> to vector<8xf32>
    %78 = vector.shape_cast %77 : vector<8xf32> to vector<8x1xf32>
    %cst_24 = arith.constant 3.200000e+01 : f32
    %79 = vector.broadcast %cst_24 : f32 to vector<8x1xf32>
    %80 = arith.divf %78, %79 : vector<8x1xf32>
    %81 = vector.broadcast %80 : vector<8x1xf32> to vector<8x32xf32>
    %82 = arith.subf %73, %81 : vector<8x32xf32>
    %83 = arith.mulf %82, %82 : vector<8x32xf32>
    %cst_25 = arith.constant dense<0.000000e+00> : vector<8xf32>
    %84 = vector.multi_reduction <add>, %83, %cst_25 [1] : vector<8x32xf32> to vector<8xf32>
    %85 = vector.shape_cast %84 : vector<8xf32> to vector<8x1xf32>
    %cst_26 = arith.constant 3.200000e+01 : f32
    %86 = vector.broadcast %cst_26 : f32 to vector<8x1xf32>
    %87 = arith.divf %85, %86 : vector<8x1xf32>
    %cst_27 = arith.constant 9.99999974E-6 : f32
    %88 = vector.broadcast %cst_27 : f32 to vector<8x1xf32>
    %89 = arith.addf %87, %88 : vector<8x1xf32>
    %90 = math.rsqrt %89 : vector<8x1xf32>
    %91 = vector.broadcast %90 : vector<8x1xf32> to vector<8x32xf32>
    %92 = arith.mulf %82, %91 : vector<8x32xf32>
    %93 = vector.broadcast %75 : vector<1x32xf32> to vector<8x32xf32>
    %94 = arith.mulf %92, %93 : vector<8x32xf32>
    %95 = vector.broadcast %76 : vector<1x32xf32> to vector<8x32xf32>
    %96 = arith.addf %94, %95 : vector<8x32xf32>
    %c0_28 = arith.constant 0 : index
    %c0_29 = arith.constant 0 : index
    %97 = vector.load %arg7[%c0_28, %c0_29] : memref<8x32xf32, #tpu.memory_space<vmem>>, vector<8x32xf32>
    tpu.vector_store %arg7[%c0_28, %c0_29], %96 {strides = array<i32>} : memref<8x32xf32, #tpu.memory_space<vmem>>, vector<8x32xf32>,
    return
  }
  func.func @transform_0(%arg0: i32) -> (i32, i32) {
    %c0_i32 = arith.constant 0 : i32
    %c0_i32_0 = arith.constant 0 : i32
    return %arg0, %c0_i32 : i32, i32
  }
  func.func @transform_1(%arg0: i32) -> (i32, i32) {
    %c0_i32 = arith.constant 0 : i32
    %c0_i32_0 = arith.constant 0 : i32
    return %arg0, %c0_i32 : i32, i32
  }
  func.func @transform_2(%arg0: i32) -> (i32, i32) {
    %c0_i32 = arith.constant 0 : i32
    %c0_i32_0 = arith.constant 0 : i32
    %c0_i32_1 = arith.constant 0 : i32
    return %c0_i32, %c0_i32_0 : i32, i32
  }
  func.func @transform_3(%arg0: i32) -> (i32, i32) {
    %c0_i32 = arith.constant 0 : i32
    %c0_i32_0 = arith.constant 0 : i32
    %c0_i32_1 = arith.constant 0 : i32
    return %c0_i32, %c0_i32_0 : i32, i32
  }
  func.func @transform_4(%arg0: i32) -> (i32, i32) {
    %c0_i32 = arith.constant 0 : i32
    %c0_i32_0 = arith.constant 0 : i32
    %c0_i32_1 = arith.constant 0 : i32
    return %c0_i32, %c0_i32_0 : i32, i32
  }
  func.func @transform_5(%arg0: i32) -> (i32, i32) {
    %c0_i32 = arith.constant 0 : i32
    %c0_i32_0 = arith.constant 0 : i32
    %c0_i32_1 = arith.constant 0 : i32
    return %c0_i32, %c0_i32_0 : i32, i32
  }
  func.func @transform_6(%arg0: i32) -> (i32, i32) {
    %c0_i32 = arith.constant 0 : i32
    %c0_i32_0 = arith.constant 0 : i32
    return %arg0, %c0_i32 : i32, i32
  }
}

module attributes {stable_mosaic.version = 11 : i64} {
  func.func @lngru2d_cell_kernel(%arg0: i32, %arg1: memref<8x16xf32, #tpu.memory_space<vmem>>, %arg2: memref<8x64xf32, #tpu.memory_space<vmem>>, %arg3: memref<16x128xf32, #tpu.memory_space<vmem>>, %arg4: memref<64x128xf32, #tpu.memory_space<vmem>>, %arg5: memref<4x128xf32, #tpu.memory_space<vmem>>, %arg6: memref<2x32xf32, #tpu.memory_space<vmem>>, %arg7: memref<8x32xf32, #tpu.memory_space<vmem>>) attributes {dimension_semantics = [#tpu.dimension_semantics<parallel>], iteration_bounds = array<i64: 1>, scalar_prefetch = 0 : i64, scratch_operands = 0 : i64, tpu.core_type = #tpu.core_type<tc>, window_params = [{transform_indices = @transform_0, window_bounds = array<i64: 8, 16>}, {transform_indices = @transform_1, window_bounds = array<i64: 8, 64>}, {pipeline_mode = #tpu.pipeline_mode<synchronous>, transform_indices = @transform_2, window_bounds = array<i64: 16, 128>}, {pipeline_mode = #tpu.pipeline_mode<synchronous>, transform_indices = @transform_3, window_bounds = array<i64: 64, 128>}, {pipeline_mode = #tpu.pipeline_mode<synchronous>, transform_indices = @transform_4, window_bounds = array<i64: 4, 128>}, {pipeline_mode = #tpu.pipeline_mode<synchronous>, transform_indices = @transform_5, window_bounds = array<i64: 2, 32>}, {transform_indices = @transform_6, window_bounds = array<i64: 8, 32>}]} {
    %c0 = arith.constant 0 : index
    %c0_0 = arith.constant 0 : index
    %0 = vector.load %arg2[%c0, %c0_0] : memref<8x64xf32, #tpu.memory_space<vmem>>, vector<8x64xf32>
    %c0_1 = arith.constant 0 : index
    %c0_2 = arith.constant 0 : index
    %1 = vector.load %arg1[%c0_1, %c0_2] : memref<8x16xf32, #tpu.memory_space<vmem>>, vector<8x16xf32>
    %c0_3 = arith.constant 0 : index
    %c0_4 = arith.constant 0 : index
    %2 = vector.load %arg3[%c0_3, %c0_4] : memref<16x128xf32, #tpu.memory_space<vmem>>, vector<16x128xf32>
    %cst = arith.constant dense<0.000000e+00> : vector<8x128xf32>
    %3 = tpu.matmul %1, %2, %cst {dimension_numbers = #tpu.dot_dimension_numbers<[1], [0], [0], [1], [0, 0, 1, 1], [], []>} : vector<8x16xf32>, vector<16x128xf32>, vector<8x128xf32> -> vector<8x128xf32>
    %c0_5 = arith.constant 0 : index
    %c0_6 = arith.constant 0 : index
    %4 = vector.load %arg4[%c0_5, %c0_6] : memref<64x128xf32, #tpu.memory_space<vmem>>, vector<64x128xf32>
    %cst_7 = arith.constant dense<0.000000e+00> : vector<8x128xf32>
    %5 = tpu.matmul %0, %4, %cst_7 {dimension_numbers = #tpu.dot_dimension_numbers<[1], [0], [0], [1], [0, 0, 1, 1], [], []>} : vector<8x64xf32>, vector<64x128xf32>, vector<8x128xf32> -> vector<8x128xf32>
    %c0_8 = arith.constant 0 : index
    %c0_9 = arith.constant 0 : index
    %6 = vector.load %arg5[%c0_8, %c0_9] : memref<4x128xf32, #tpu.memory_space<vmem>>, vector<4x128xf32>
    %7 = vector.extract_strided_slice %6 {offsets = [0, 0], sizes = [1, 128], strides = [1, 1]} : vector<4x128xf32> to vector<1x128xf32>
    %8 = vector.extract_strided_slice %6 {offsets = [1, 0], sizes = [1, 128], strides = [1, 1]} : vector<4x128xf32> to vector<1x128xf32>
    %cst_10 = arith.constant dense<0.000000e+00> : vector<8xf32>
    %9 = vector.multi_reduction <add>, %3, %cst_10 [1] : vector<8x128xf32> to vector<8xf32>
    %10 = vector.shape_cast %9 : vector<8xf32> to vector<8x1xf32>
    %cst_11 = arith.constant 1.280000e+02 : f32
    %11 = vector.broadcast %cst_11 : f32 to vector<8x1xf32>
    %12 = arith.divf %10, %11 : vector<8x1xf32>
    %13 = vector.broadcast %12 : vector<8x1xf32> to vector<8x128xf32>
    %14 = arith.subf %3, %13 : vector<8x128xf32>
    %15 = arith.mulf %14, %14 : vector<8x128xf32>
    %cst_12 = arith.constant dense<0.000000e+00> : vector<8xf32>
    %16 = vector.multi_reduction <add>, %15, %cst_12 [1] : vector<8x128xf32> to vector<8xf32>
    %17 = vector.shape_cast %16 : vector<8xf32> to vector<8x1xf32>
    %cst_13 = arith.constant 1.280000e+02 : f32
    %18 = vector.broadcast %cst_13 : f32 to vector<8x1xf32>
    %19 = arith.divf %17, %18 : vector<8x1xf32>
    %cst_14 = arith.constant 9.99999974E-6 : f32
    %20 = vector.broadcast %cst_14 : f32 to vector<8x1xf32>
    %21 = arith.addf %19, %20 : vector<8x1xf32>
    %22 = math.rsqrt %21 : vector<8x1xf32>
    %23 = vector.broadcast %22 : vector<8x1xf32> to vector<8x128xf32>
    %24 = arith.mulf %14, %23 : vector<8x128xf32>
    %25 = vector.broadcast %7 : vector<1x128xf32> to vector<8x128xf32>
    %26 = arith.mulf %24, %25 : vector<8x128xf32>
    %27 = vector.broadcast %8 : vector<1x128xf32> to vector<8x128xf32>
    %28 = arith.addf %26, %27 : vector<8x128xf32>
    %29 = vector.extract_strided_slice %6 {offsets = [2, 0], sizes = [1, 128], strides = [1, 1]} : vector<4x128xf32> to vector<1x128xf32>
    %30 = vector.extract_strided_slice %6 {offsets = [3, 0], sizes = [1, 128], strides = [1, 1]} : vector<4x128xf32> to vector<1x128xf32>
    %cst_15 = arith.constant dense<0.000000e+00> : vector<8xf32>
    %31 = vector.multi_reduction <add>, %5, %cst_15 [1] : vector<8x128xf32> to vector<8xf32>
    %32 = vector.shape_cast %31 : vector<8xf32> to vector<8x1xf32>
    %cst_16 = arith.constant 1.280000e+02 : f32
    %33 = vector.broadcast %cst_16 : f32 to vector<8x1xf32>
    %34 = arith.divf %32, %33 : vector<8x1xf32>
    %35 = vector.broadcast %34 : vector<8x1xf32> to vector<8x128xf32>
    %36 = arith.subf %5, %35 : vector<8x128xf32>
    %37 = arith.mulf %36, %36 : vector<8x128xf32>
    %cst_17 = arith.constant dense<0.000000e+00> : vector<8xf32>
    %38 = vector.multi_reduction <add>, %37, %cst_17 [1] : vector<8x128xf32> to vector<8xf32>
    %39 = vector.shape_cast %38 : vector<8xf32> to vector<8x1xf32>
    %cst_18 = arith.constant 1.280000e+02 : f32
    %40 = vector.broadcast %cst_18 : f32 to vector<8x1xf32>
    %41 = arith.divf %39, %40 : vector<8x1xf32>
    %cst_19 = arith.constant 9.99999974E-6 : f32
    %42 = vector.broadcast %cst_19 : f32 to vector<8x1xf32>
    %43 = arith.addf %41, %42 : vector<8x1xf32>
    %44 = math.rsqrt %43 : vector<8x1xf32>
    %45 = vector.broadcast %44 : vector<8x1xf32> to vector<8x128xf32>
    %46 = arith.mulf %36, %45 : vector<8x128xf32>
    %47 = vector.broadcast %29 : vector<1x128xf32> to vector<8x128xf32>
    %48 = arith.mulf %46, %47 : vector<8x128xf32>
    %49 = vector.broadcast %30 : vector<1x128xf32> to vector<8x128xf32>
    %50 = arith.addf %48, %49 : vector<8x128xf32>
    %51 = vector.extract_strided_slice %50 {offsets = [0, 96], sizes = [8, 32], strides = [1, 1]} : vector<8x128xf32> to vector<8x32xf32>
    %52 = arith.addf %28, %50 : vector<8x128xf32>
    %53 = vector.extract_strided_slice %52 {offsets = [0, 0], sizes = [8, 96], strides = [1, 1]} : vector<8x128xf32> to vector<8x96xf32>
    %54 = arith.negf %53 : vector<8x96xf32>
    %55 = math.exp %54 : vector<8x96xf32>
    %cst_20 = arith.constant 1.000000e+00 : f32
    %56 = vector.broadcast %cst_20 : f32 to vector<8x96xf32>
    %57 = arith.addf %56, %55 : vector<8x96xf32>
    %58 = arith.divf %56, %57 : vector<8x96xf32>
    %59 = vector.extract_strided_slice %58 {offsets = [0, 0], sizes = [8, 32], strides = [1, 1]} : vector<8x96xf32> to vector<8x32xf32>
    %60 = vector.extract_strided_slice %58 {offsets = [0, 32], sizes = [8, 32], strides = [1, 1]} : vector<8x96xf32> to vector<8x32xf32>
    %61 = vector.extract_strided_slice %58 {offsets = [0, 64], sizes = [8, 32], strides = [1, 1]} : vector<8x96xf32> to vector<8x32xf32>
    %62 = vector.extract_strided_slice %52 {offsets = [0, 96], sizes = [8, 32], strides = [1, 1]} : vector<8x128xf32> to vector<8x32xf32>
    %63 = arith.mulf %59, %51 : vector<8x32xf32>
    %64 = arith.subf %62, %63 : vector<8x32xf32>
    %65 = math.tanh %64 : vector<8x32xf32>
    %66 = vector.extract_strided_slice %0 {offsets = [0, 0], sizes = [8, 32], strides = [1, 1]} : vector<8x64xf32> to vector<8x32xf32>
    %67 = vector.extract_strided_slice %0 {offsets = [0, 32], sizes = [8, 32], strides = [1, 1]} : vector<8x64xf32> to vector<8x32xf32>
    %68 = arith.subf %66, %67 : vector<8x32xf32>
    %69 = arith.mulf %61, %68 : vector<8x32xf32>
    %70 = arith.addf %67, %69 : vector<8x32xf32>
    %71 = arith.subf %70, %65 : vector<8x32xf32>
    %72 = arith.mulf %60, %71 : vector<8x32xf32>
    %73 = arith.addf %65, %72 : vector<8x32xf32>
    %c0_21 = arith.constant 0 : index
    %c0_22 = arith.constant 0 : index
    %74 = vector.load %arg6[%c0_21, %c0_22] : memref<2x32xf32, #tpu.memory_space<vmem>>, vector<2x32xf32>
    %75 = vector.extract_strided_slice %74 {offsets = [0, 0], sizes = [1, 32], strides = [1, 1]} : vector<2x32xf32> to vector<1x32xf32>
    %76 = vector.extract_strided_slice %74 {offsets = [1, 0], sizes = [1, 32], strides = [1, 1]} : vector<2x32xf32> to vector<1x32xf32>
    %cst_23 = arith.constant dense<0.000000e+00> : vector<8xf32>
    %77 = vector.multi_reduction <add>, %73, %cst_23 [1] : vector<8x32xf32> to vector<8xf32>
    %78 = vector.shape_cast %77 : vector<8xf32> to vector<8x1xf32>
    %cst_24 = arith.constant 3.200000e+01 : f32
    %79 = vector.broadcast %cst_24 : f32 to vector<8x1xf32>
    %80 = arith.divf %78, %79 : vector<8x1xf32>
    %81 = vector.broadcast %80 : vector<8x1xf32> to vector<8x32xf32>
    %82 = arith.subf %73, %81 : vector<8x32xf32>
    %83 = arith.mulf %82, %82 : vector<8x32xf32>
    %cst_25 = arith.constant dense<0.000000e+00> : vector<8xf32>
    %84 = vector.multi_reduction <add>, %83, %cst_25 [1] : vector<8x32xf32> to vector<8xf32>
    %85 = vector.shape_cast %84 : vector<8xf32> to vector<8x1xf32>
    %cst_26 = arith.constant 3.200000e+01 : f32
    %86 = vector.broadcast %cst_26 : f32 to vector<8x1xf32>
    %87 = arith.divf %85, %86 : vector<8x1xf32>
    %cst_27 = arith.constant 9.99999974E-6 : f32
    %88 = vector.broadcast %cst_27 : f32 to vector<8x1xf32>
    %89 = arith.addf %87, %88 : vector<8x1xf32>
    %90 = math.rsqrt %89 : vector<8x1xf32>
    %91 = vector.broadcast %90 : vector<8x1xf32> to vector<8x32xf32>
    %92 = arith.mulf %82, %91 : vector<8x32xf32>
    %93 = vector.broadcast %75 : vector<1x32xf32> to vector<8x32xf32>
    %94 = arith.mulf %92, %93 : vector<8x32xf32>
    %95 = vector.broadcast %76 : vector<1x32xf32> to vector<8x32xf32>
    %96 = arith.addf %94, %95 : vector<8x32xf32>
    %c0_28 = arith.constant 0 : index
    %c0_29 = arith.constant 0 : index
    %97 = vector.load %arg7[%c0_28, %c0_29] : memref<8x32xf32, #tpu.memory_space<vmem>>, vector<8x32xf32>
    tpu.vector_store %arg7[%c0_28, %c0_29], %96 {strides = array<i32>} : memref<8x32xf32, #tpu.memory_space<vmem>>, vector<8x32xf32>,
    return
  }
  func.func @transform_0(%arg0: i32) -> (i32, i32) {
    %c0_i32 = arith.constant 0 : i32
    %c0_i32_0 = arith.constant 0 : i32
    return %arg0, %c0_i32 : i32, i32
  }
  func.func @transform_1(%arg0: i32) -> (i32, i32) {
    %c0_i32 = arith.constant 0 : i32
    %c0_i32_0 = arith.constant 0 : i32
    return %arg0, %c0_i32 : i32, i32
  }
  func.func @transform_2(%arg0: i32) -> (i32, i32) {
    %c0_i32 = arith.constant 0 : i32
    %c0_i32_0 = arith.constant 0 : i32
    %c0_i32_1 = arith.constant 0 : i32
    return %c0_i32, %c0_i32_0 : i32, i32
  }
  func.func @transform_3(%arg0: i32) -> (i32, i32) {
    %c0_i32 = arith.constant 0 : i32
    %c0_i32_0 = arith.constant 0 : i32
    %c0_i32_1 = arith.constant 0 : i32
    return %c0_i32, %c0_i32_0 : i32, i32
  }
  func.func @transform_4(%arg0: i32) -> (i32, i32) {
    %c0_i32 = arith.constant 0 : i32
    %c0_i32_0 = arith.constant 0 : i32
    %c0_i32_1 = arith.constant 0 : i32
    return %c0_i32, %c0_i32_0 : i32, i32
  }
  func.func @transform_5(%arg0: i32) -> (i32, i32) {
    %c0_i32 = arith.constant 0 : i32
    %c0_i32_0 = arith.constant 0 : i32
    %c0_i32_1 = arith.constant 0 : i32
    return %c0_i32, %c0_i32_0 : i32, i32
  }
  func.func @transform_6(%arg0: i32) -> (i32, i32) {
    %c0_i32 = arith.constant 0 : i32
    %c0_i32_0 = arith.constant 0 : i32
    return %arg0, %c0_i32 : i32, i32
  }
}

</mosaic_0001>

<bundles_post_ra>
// kernel: tpu_custom_call.1
= control target key start
LH: loop header
LB: loop body
LE: loop exit
PB: predicated region body
PF: predicated region fallthrough
CT: control target
= control target key end

     0   :  { %11 = vsyncpa [#allocation3], 0  ;;  %s723_s0 = inlined_call_operand.hbm [shape: f32[8,16], index: 0, kind: input, shape index: {}]   ;;  %s724_s1 = inlined_call_operand.hbm [shape: f32[8,64], index: 1, kind: input, shape index: {}]   ;;  %s725_s2 = inlined_call_operand.hbm [shape: f32[16,128], index: 2, kind: input, shape index: {}]   ;;  %s726_s3 = inlined_call_operand.hbm [shape: f32[64,128], index: 3, kind: input, shape index: {}]   ;;  %s727_s4 = inlined_call_operand.vmem [shape: f32[4,128], index: 4, kind: input, shape index: {}]   ;;  %s728_s5 = inlined_call_operand.vmem [shape: f32[2,32], index: 5, kind: input, shape index: {}]   ;;  %s729_s6 = inlined_call_operand.hbm [shape: f32[8,32], index: 6, kind: output, shape index: {}]  }
   0x1   :  { %12 = vsyncpa [#allocation6], 0 }
   0x2   :  { %13 = vsyncpa [#allocation9], 0 }
   0x3   :  { %14 = vsyncpa [#allocation4], 0  ;;  %s585_s21 = smov [#allocation5]   ;;  %s586_s23 = smov [#allocation2]  }
   0x4   :  { %s31_s22 = sshll.u32 %s585_s21, 4  ;;  %s21_s24 = sshll.u32 %s586_s23, 4  ;;  %s32_s22 = int_to_ptr.vmem [resolvable:$true] %s31_s22  ;;  %s22_s24 = int_to_ptr.vmem [resolvable:$true] %s21_s24 }
   0x5   :  { %s467_s27 = scalar_lea.hbm %s724_s1, 128 }
   0x6   :  { %p468_p0 = scmp.ne.s32.totalorder %s724_s1, %s467_s27  ;;  %p471_p1 = scmp.lt.u32.totalorder %s467_s27, %s724_s1 }
   0x8   :  { %p473_p2 = pnand %p471_p1, %p468_p0 }
   0xa   :  { %476 = shalt.err (!%p473_p2)
}
   0xb   :  { %s477_s8 = scalar_lea.vmem %s32_s22, 128  ;;  %p482_p4 = scmp.lt.s32.totalorder %s32_s22, %s32_s22 }
   0xc   :  { %p478_p3 = scmp.ne.s32.totalorder %s32_s22, %s477_s8  ;;  %p483_p5 = scmp.lt.s32.totalorder %s477_s8, %s477_s8 }
   0xe   :  { %p484_p6 = por %p483_p5, %p482_p4 }
  0x10   :  { %p485_p7 = pnand %p484_p6, %p478_p3 }
  0x12   :  { %488 = shalt.err (!%p485_p7)
}
  0x13   :  { %34 = dma.hbm_to_vmem [thread:$0]  %s724_s1, 128, %s32_s22, [#allocation6]  }
  0x14   :  { %s489_s13 = scalar_lea.hbm %s723_s0, 128 }
  0x15   :  { %p490_p8 = scmp.ne.s32.totalorder %s723_s0, %s489_s13  ;;  %p493_p9 = scmp.lt.u32.totalorder %s489_s13, %s723_s0 }
  0x17   :  { %p495_p10 = pnand %p493_p9, %p490_p8 }
  0x19   :  { %498 = shalt.err (!%p495_p10)
}
  0x1a   :  { %s499_s18 = scalar_lea.vmem %s22_s24, 128  ;;  %p504_p12 = scmp.lt.s32.totalorder %s22_s24, %s22_s24 }
  0x1b   :  { %p500_p11 = scmp.ne.s32.totalorder %s22_s24, %s499_s18  ;;  %p505_p13 = scmp.lt.s32.totalorder %s499_s18, %s499_s18 }
  0x1d   :  { %p506_p0 = por %p505_p13, %p504_p12 }
  0x1f   :  { %p507_p1 = pnand %p506_p0, %p500_p11 }
  0x21   :  { %510 = shalt.err (!%p507_p1)
}
  0x22   :  { %24 = dma.hbm_to_vmem [thread:$0]  %s723_s0, 128, %s22_s24, [#allocation3]  }
  0x23   :  { %s587_s20 = smov [#allocation7]   ;;  %s511_s25 = scalar_lea.hbm %s725_s2, 256 }
  0x24   :  { %s40_s21 = sshll.u32 %s587_s20, 4  ;;  %p512_p2 = scmp.ne.s32.totalorder %s725_s2, %s511_s25  ;;  %s41_s21 = int_to_ptr.vmem [resolvable:$true] %s40_s21 }
  0x25   :  { %p515_p3 = scmp.lt.u32.totalorder %s511_s25, %s725_s2 }
  0x27   :  { %p517_p4 = pnand %p515_p3, %p512_p2 }
  0x29   :  { %520 = shalt.err (!%p517_p4)
}
  0x2a   :  { %s521_s30 = scalar_lea.vmem %s41_s21, 256  ;;  %p526_p6 = scmp.lt.s32.totalorder %s41_s21, %s41_s21 }
  0x2b   :  { %p522_p5 = scmp.ne.s32.totalorder %s41_s21, %s521_s30  ;;  %p527_p7 = scmp.lt.s32.totalorder %s521_s30, %s521_s30 }
  0x2d   :  { %p528_p8 = por %p527_p7, %p526_p6 }
  0x2f   :  { %p529_p9 = pnand %p528_p8, %p522_p5 }
  0x31   :  { %532 = shalt.err (!%p529_p9)
}
  0x32   :  { %s588_s0 = smov 128   ;;  %s589_s24 = smov 8  }
  0x33   :  { %46 = dma.hbm_to_vmem [thread:$0]  %s725_s2, 256, %s41_s21, [#allocation6], %s588_s0, %s588_s0, %s589_s24  }
  0x34   :  { %s590_s9 = smov [#allocation8]   ;;  %s533_s13 = scalar_lea.hbm %s726_s3, 1024 }
  0x35   :  { %s52_s10 = sshll.u32 %s590_s9, 4  ;;  %p534_p10 = scmp.ne.s32.totalorder %s726_s3, %s533_s13  ;;  %s53_s10 = int_to_ptr.vmem [resolvable:$true] %s52_s10 }
  0x36   :  { %p537_p11 = scmp.lt.u32.totalorder %s533_s13, %s726_s3 }
  0x38   :  { %p539_p12 = pnand %p537_p11, %p534_p10 }
  0x3a   :  { %542 = shalt.err (!%p539_p12)
}
  0x3b   :  { %s543_s18 = scalar_lea.vmem %s53_s10, 1024  ;;  %p548_p0 = scmp.lt.s32.totalorder %s53_s10, %s53_s10 }
  0x3c   :  { %p544_p13 = scmp.ne.s32.totalorder %s53_s10, %s543_s18  ;;  %p549_p1 = scmp.lt.s32.totalorder %s543_s18, %s543_s18 }
  0x3e   :  { %p550_p2 = por %p549_p1, %p548_p0 }
  0x40   :  { %p551_p3 = pnand %p550_p2, %p544_p13 }
  0x42   :  { %554 = shalt.err (!%p551_p3)
}
  0x43   :  { %58 = dma.hbm_to_vmem [thread:$0]  %s726_s3, 1024, %s53_s10, [#allocation9], %s588_s0, %s588_s0, %s589_s24  }
  0x44   :  { %577 = dma.done.wait [#allocation3], 128  }
  0x45   :  { %578 = vsyncadd [#allocation3], 4294967168 }
  0x46   :  { %579 = dma.done.wait [#allocation6], 384  }
  0x47   :  { %580 = vsyncadd [#allocation6], 4294966912 }
  0x48   :  { %581 = dma.done.wait [#allocation9], 1024  }
  0x49   :  { %582 = vsyncadd [#allocation9], 4294966272  ;;  %v591_v0 = vmov 0.0|0.0   ;;  %vm592_vm0 = vmmov 0   ;;  %v593_v1 = vmov 0.0   ;;  %v153_v2 = vld [vmem:[#allocation8] sm:$0xff]  ;;  %v248_v33 = vlaneseq }
  0x4a   :  { %430 = vmatprep.subr.bf16.mxu1 %v591_v0  ;;  %424 = vmatprep.mubr.msk.f32.mxu1 %vm592_vm0, %v593_v1  ;;  %v154_v3 = vld [vmem:[#allocation8 + $0x8] sm:$0xff]  ;;  %v155_v4 = vld [vmem:[#allocation8 + $0x10] sm:$0xff]  ;;  %v156_v6 = vld [vmem:[#allocation8 + $0x18] sm:$0xff]  ;;  %vm79_vm1 = vcmask 130048   ;;  %vm161_vm2 = vcmask 523264   ;;  %s594_s3 = smov 96  }
  0x4b   :  { %427 = vmatprep.subr.bf16.mxu0 %v591_v0  ;;  %405 = vmatprep.mubr.msk.f32.mxu0 %vm592_vm0, %v593_v1  ;;  %v431_v5 = vpack.c.bf16 %v154_v3, %v153_v2  ;;  %v434_v7 = vpack.c.bf16 %v156_v6, %v155_v4  ;;  %v77_v8 = vld [vmem:[#allocation7] sm:$0xff]  ;;  %v78_v9 = vld [vmem:[#allocation7 + $0x8] sm:$0xff]  ;;  %v157_v10 = vld [vmem:[#allocation8 + $0x20] sm:$0xff]  ;;  %v686_v37 = vshrl.u32 %v248_v33, 7  ;;  %s595_s21 = smov 32   ;;  %vm327_vm3 = vcmask 261120  }
  0x4c   :  { %v158_v11 = vld [vmem:[#allocation8 + $0x28] sm:$0xff]  ;;  %v428_v12 = vpack.c.bf16 %v78_v9, %v77_v8  ;;  %v76_v13 = vld [vmem:[#allocation2] sm:$0xff]  ;;  %v159_v15 = vld [vmem:[#allocation8 + $0x30] sm:$0xff] }
  0x4d   :  { %432 = vmatpush3.bf16.msra.mxu1 %v431_v5  ;;  %v437_v14 = vpack.c.bf16 %v158_v11, %v157_v10  ;;  %v160_v16 = vld [vmem:[#allocation8 + $0x38] sm:$0xff]  ;;  %v681_v18 = vld [vmem:[#allocation5] sm:$0xff]  ;;  %v271_v39 = vsub.s32 2, %v686_v37  ;;  %v235_v40 = vld [vmem:[%s727_s4] sm:$0xf]  ;;  %v276_v41 = vsub.s32 3, %v686_v37 }
  0x4e   :  { %433 = vmatprep.subr.bf16.mxu1 %v591_v0  ;;  %429 = vmatpush3.bf16.msra.mxu0 %v428_v12  ;;  %v440_v17 = vpack.c.bf16 %v160_v16, %v159_v15  ;;  %v250_v42 = vsub.s32 0, %v686_v37  ;;  %v255_v45 = vsub.s32 1, %v686_v37  ;;  %s596_s4 = smov 64   ;;  %v322_v15 = vld [vmem:[%s728_s5] sm:$0x3]  ;;  %s597_s5 = smov [#allocation10]  }
  0x4f   :  { %v272_v43 = vrot.slane %v235_v40, %v271_v39  ;;  %v277_v47 = vrot.slane %v235_v40, %v276_v41  ;;  %s375_s25 = sshll.u32 %s597_s5, 4  ;;  %s376_s25 = int_to_ptr.vmem [resolvable:$true] %s375_s25 }
  0x50   :  { %v251_v48 = vrot.slane %v235_v40, %v250_v42  ;;  %v256_v51 = vrot.slane %v235_v40, %v255_v45  ;;  %v349_v16 = vrot.slane %v322_v15, %v250_v42  ;;  %s555_s26 = scalar_lea.vmem %s376_s25, 128  ;;  %p560_p5 = scmp.lt.s32.totalorder %s376_s25, %s376_s25 }
  0x51   :  { %435 = vmatpush3.bf16.msra.mxu1 %v434_v7  ;;  %406 = vmatmul.mubr.msk.f32.vlgmr.msra.gmra.mrb[0].mxu0 %vm79_vm1, %v76_v13  ;;  %p556_p4 = scmp.ne.s32.totalorder %s376_s25, %s555_s26  ;;  %p561_p6 = scmp.lt.s32.totalorder %s555_s26, %s555_s26 }
  0x52   :  { %436 = vmatprep.subr.bf16.mxu1 %v591_v0 }
  0x53   :  { %p562_p7 = por %p561_p6, %p560_p5 }
  0x55   :  { %438 = vmatpush3.bf16.msra.mxu1 %v437_v14  ;;  %p563_p8 = pnand %p562_p7, %p556_p4 }
  0x56   :  { %439 = vmatprep.subr.bf16.mxu1 %v591_v0 }
  0x59   :  { %441 = vmatpush3.bf16.msra.mxu1 %v440_v17 }
  0x5c   :  { %425 = vmatmul.mubr.msk.f32.vlgmr.msra.gmra.mrb[0].mxu1 %vm161_vm2, %v681_v18 }
 0x124   :  { %v149_v19 = vpop.f32.mrb[0].mxu0 }
 0x125   :  { %v407_v20 = vpop.f32.mrb[1].mxu0 }
 0x12f   :  { %v231_v21 = vpop.f32.mrb[0].mxu1 }
 0x130   :  { %258 = vadd.xlane.f32.xlu0 %v231_v21  ;;  %v426_v22 = vpop.f32.mrb[1].mxu1 }
 0x134   :  { %236 = vadd.xlane.f32.xlu0 %v149_v19 }
 0x1bd   :  { %v259_v23 = vpop.xlane.xlu0 %258 }
 0x1be   :  { %v260_v24 = vmul.f32 0.0078125, %v259_v23  ;;  %v358_v23 = vrot.slane %v322_v15, %v255_v45 }
 0x1c0   :  { %v261_v25 = vsub.f32 %v231_v21, %v260_v24 }
 0x1c1   :  { %v237_v26 = vpop.xlane.xlu0 %236 }
 0x1c2   :  { %v239_v27 = vmul.f32 0.0078125, %v237_v26  ;;  %v262_v28 = vmul.f32 %v261_v25, %v261_v25 }
 0x1c4   :  { %v240_v29 = vsub.f32 %v149_v19, %v239_v27  ;;  %263 = vadd.xlane.f32.xlu1 %v262_v28 }
 0x1c6   :  { %v241_v30 = vmul.f32 %v240_v29, %v240_v29 }
 0x1c8   :  { %242 = vadd.xlane.f32.xlu1 %v241_v30 }
 0x1d9   :  { %297 = vrot.lane.b32.xlu1 %v681_v18, %s594_s3 }
 0x251   :  { %v264_v31 = vpop.xlane.xlu1 %263 }
 0x252   :  { %v265_v32 = vmul.f32 0.0078125, %v264_v31 }
 0x254   :  { %v266_v34 = vadd.f32 1e-05, %v265_v32 }
 0x255   :  { %v243_v35 = vpop.xlane.xlu1 %242 }
 0x256   :  { %455 = vrsqrt.f32 %v266_v34  ;;  %v244_v36 = vmul.f32 0.0078125, %v243_v35 }
 0x258   :  { %v245_v38 = vadd.f32 1e-05, %v244_v36 }
 0x259   :  { %v298_v62 = vpop.permute.xlu1 %297 }
 0x25a   :  { %457 = vrsqrt.f32 %v245_v38  ;;  %v300_v0 = vsub.f32 %v681_v18, %v298_v62 }
 0x260   :  { %v456_v44 = vpop.eup %455 }
 0x261   :  { %v268_v46 = vmul.f32 %v456_v44, %v261_v25 }
 0x263   :  { %v273_v49 = vmul.f32 %v272_v43, %v268_v46 }
 0x264   :  { %v458_v50 = vpop.eup %457 }
 0x265   :  { %v278_v52 = vadd.f32 %v277_v47, %v273_v49  ;;  %v247_v53 = vmul.f32 %v458_v50, %v240_v29 }
 0x267   :  { %287 = vrot.lane.b32.xlu0 %v278_v52, %s595_s21  ;;  %v252_v54 = vmul.f32 %v251_v48, %v247_v53 }
 0x269   :  { %v257_v55 = vadd.f32 %v256_v51, %v252_v54 }
 0x26b   :  { %v279_v56 = vadd.f32 %v278_v52, %v257_v55 }
 0x26d   :  { %v388_v57 = vmul.f32 -1.442695, %v279_v56 }
 0x26f   :  { %459 = vpow2.f32 %v388_v57 }
 0x279   :  { %v460_v58 = vpop.eup %459 }
 0x27a   :  { %v283_v59 = vadd.f32 1.0, %v460_v58 }
 0x27c   :  { %461 = vrcp.f32 %v283_v59 }
 0x286   :  { %v462_v60 = vpop.eup %461 }
 0x2d9   :  { %v288_v61 = vpop.permute.xlu0 %287 }
 0x2da   :  { %v290_v63 = vmul.f32 %v462_v60, %v288_v61 }
 0x2dc   :  { %292 = vrot.lane.b32.xlu1 %v290_v63, %s594_s3 }
 0x2e0   :  { %302 = vrot.lane.b32.xlu1 %v300_v0, %s596_s4 }
 0x34e   :  { %v293_v1 = vpop.permute.xlu1 %292 }
 0x34f   :  { %v295_v2 = vsub.f32 %v279_v56, %v293_v1 }
 0x351   :  { %463 = vtanh.f32 %v295_v2 }
 0x352   :  { %v303_v3 = vpop.permute.xlu1 %302 }
 0x353   :  { %v305_v4 = vmul.f32 %v462_v60, %v303_v3 }
 0x355   :  { %307 = vrot.lane.b32.xlu0 %v305_v4, %s594_s3 }
 0x35b   :  { %v464_v5 = vpop.eup %463 }
 0x35c   :  { %312 = vrot.lane.b32.xlu1 %v464_v5, %s596_s4 }
 0x3c7   :  { %v308_v6 = vpop.permute.xlu0 %307 }
 0x3c8   :  { %v310_v7 = vadd.f32 %v308_v6, %v681_v18 }
 0x3ce   :  { %v313_v8 = vpop.permute.xlu1 %312 }
 0x3cf   :  { %v315_v9 = vsub.f32 %v310_v7, %v313_v8 }
 0x3d1   :  { %v316_v10 = vmul.f32 %v462_v60, %v315_v9 }
 0x3d3   :  { %318 = vrot.lane.b32.xlu0 %v316_v10, %s596_s4 }
 0x445   :  { %v319_v11 = vpop.permute.xlu0 %318 }
 0x446   :  { %v321_v12 = vadd.f32 %v464_v5, %v319_v11 }
 0x448   :  { %324 = vrot.lane.b32.xlu1 %v321_v12, %s595_s21 }
 0x4ba   :  { %v325_v13 = vpop.permute.xlu1 %324 }
 0x4bb   :  { %v328_v14 = vsel %vm327_vm3, %v325_v13, 0.0 }
 0x4bc   :  { %329 = vadd.xlane.f32.xlu0 %v328_v14 }
 0x4d2   :  { %351 = vrot.lane.b32.xlu0 %v349_v16, %s594_s3 }
 0x549   :  { %v330_v17 = vpop.xlane.xlu0 %329 }
 0x54a   :  { %v332_v18 = vmul.f32 0.03125, %v330_v17 }
 0x54c   :  { %v333_v19 = vsub.f32 %v321_v12, %v332_v18 }
 0x54d   :  { %v352_v28 = vpop.permute.xlu0 %351 }
 0x54e   :  { %v334_v20 = vmul.f32 %v333_v19, %v333_v19 }
 0x550   :  { %336 = vrot.lane.b32.xlu1 %v334_v20, %s595_s21 }
 0x5c2   :  { %v337_v21 = vpop.permute.xlu1 %336 }
 0x5c3   :  { %v339_v22 = vsel %vm327_vm3, %v337_v21, 0.0 }
 0x5c4   :  { %340 = vadd.xlane.f32.xlu1 %v339_v22 }
 0x5d5   :  { %360 = vrot.lane.b32.xlu1 %v358_v23, %s594_s3 }
 0x651   :  { %v341_v24 = vpop.xlane.xlu1 %340 }
 0x652   :  { %v342_v25 = vmul.f32 0.03125, %v341_v24 }
 0x654   :  { %v343_v26 = vadd.f32 1e-05, %v342_v25 }
 0x655   :  { %v361_v30 = vpop.permute.xlu1 %360 }
 0x656   :  { %465 = vrsqrt.f32 %v343_v26 }
 0x660   :  { %v466_v27 = vpop.eup %465 }
 0x661   :  { %v345_v29 = vmul.f32 %v466_v27, %v333_v19 }
 0x663   :  { %v354_v31 = vmul.f32 %v352_v28, %v345_v29 }
 0x665   :  { %v363_v32 = vadd.f32 %v361_v30, %v354_v31 }
 0x667   :  { %365 = vrot.lane.b32.xlu0 %v363_v32, %s595_s21 }
 0x6d9   :  { %v366_v33 = vpop.permute.xlu0 %365 }
 0x6da   :  { %368 = vst.msk [vmem:[#allocation10] sm:$0xff] %vm327_vm3, %v366_v33 }
 0x6db   :  { %566 = shalt.err (!%p563_p8)
}
 0x6dc   :  { %s567_s29 = scalar_lea.hbm %s729_s6, 128 }
 0x6dd   :  { %p568_p9 = scmp.ne.s32.totalorder %s729_s6, %s567_s29  ;;  %p571_p10 = scmp.lt.u32.totalorder %s567_s29, %s729_s6 }
 0x6df   :  { %p573_p11 = pnand %p571_p10, %p568_p9 }
 0x6e1   :  { %576 = shalt.err (!%p573_p11)
}
 0x6e2   :  { %378 = dma.vmem_to_hbm [thread:$0]  %s376_s25, 128, %s729_s6, [#allocation4]  }
 0x6e3   :  { %583 = dma.done.wait [#allocation4], 128  }
 0x6e4   :  { %584 = vsyncadd [#allocation4], 4294967168 }
 0x6e5   :  { %382 = vsyncpa [#allocation3], 1 }
 0x6e6   :  { %383 = vsyncpa [#allocation6], 1 }
 0x6e7   :  { %384 = vsyncpa [#allocation9], 1 }
 0x6e8   :  { %385 = vsyncpa [#allocation4], 1 }

// kernel: tpu_custom_call.1
= control target key start
LH: loop header
LB: loop body
LE: loop exit
PB: predicated region body
PF: predicated region fallthrough
CT: control target
= control target key end

     0   :  { %11 = vsyncpa [#allocation3], 0  ;;  %s723_s0 = inlined_call_operand.hbm [shape: f32[8,16], index: 0, kind: input, shape index: {}]   ;;  %s724_s1 = inlined_call_operand.hbm [shape: f32[8,64], index: 1, kind: input, shape index: {}]   ;;  %s725_s2 = inlined_call_operand.hbm [shape: f32[16,128], index: 2, kind: input, shape index: {}]   ;;  %s726_s3 = inlined_call_operand.hbm [shape: f32[64,128], index: 3, kind: input, shape index: {}]   ;;  %s727_s4 = inlined_call_operand.vmem [shape: f32[4,128], index: 4, kind: input, shape index: {}]   ;;  %s728_s5 = inlined_call_operand.vmem [shape: f32[2,32], index: 5, kind: input, shape index: {}]   ;;  %s729_s6 = inlined_call_operand.hbm [shape: f32[8,32], index: 6, kind: output, shape index: {}]  }
   0x1   :  { %12 = vsyncpa [#allocation6], 0 }
   0x2   :  { %13 = vsyncpa [#allocation9], 0 }
   0x3   :  { %14 = vsyncpa [#allocation4], 0  ;;  %s585_s21 = smov [#allocation5]   ;;  %s586_s23 = smov [#allocation2]  }
   0x4   :  { %s31_s22 = sshll.u32 %s585_s21, 4  ;;  %s21_s24 = sshll.u32 %s586_s23, 4  ;;  %s32_s22 = int_to_ptr.vmem [resolvable:$true] %s31_s22  ;;  %s22_s24 = int_to_ptr.vmem [resolvable:$true] %s21_s24 }
   0x5   :  { %s467_s27 = scalar_lea.hbm %s724_s1, 128 }
   0x6   :  { %p468_p0 = scmp.ne.s32.totalorder %s724_s1, %s467_s27  ;;  %p471_p1 = scmp.lt.u32.totalorder %s467_s27, %s724_s1 }
   0x8   :  { %p473_p2 = pnand %p471_p1, %p468_p0 }
   0xa   :  { %476 = shalt.err (!%p473_p2)
}
   0xb   :  { %s477_s8 = scalar_lea.vmem %s32_s22, 128  ;;  %p482_p4 = scmp.lt.s32.totalorder %s32_s22, %s32_s22 }
   0xc   :  { %p478_p3 = scmp.ne.s32.totalorder %s32_s22, %s477_s8  ;;  %p483_p5 = scmp.lt.s32.totalorder %s477_s8, %s477_s8 }
   0xe   :  { %p484_p6 = por %p483_p5, %p482_p4 }
  0x10   :  { %p485_p7 = pnand %p484_p6, %p478_p3 }
  0x12   :  { %488 = shalt.err (!%p485_p7)
}
  0x13   :  { %34 = dma.hbm_to_vmem [thread:$0]  %s724_s1, 128, %s32_s22, [#allocation6]  }
  0x14   :  { %s489_s13 = scalar_lea.hbm %s723_s0, 128 }
  0x15   :  { %p490_p8 = scmp.ne.s32.totalorder %s723_s0, %s489_s13  ;;  %p493_p9 = scmp.lt.u32.totalorder %s489_s13, %s723_s0 }
  0x17   :  { %p495_p10 = pnand %p493_p9, %p490_p8 }
  0x19   :  { %498 = shalt.err (!%p495_p10)
}
  0x1a   :  { %s499_s18 = scalar_lea.vmem %s22_s24, 128  ;;  %p504_p12 = scmp.lt.s32.totalorder %s22_s24, %s22_s24 }
  0x1b   :  { %p500_p11 = scmp.ne.s32.totalorder %s22_s24, %s499_s18  ;;  %p505_p13 = scmp.lt.s32.totalorder %s499_s18, %s499_s18 }
  0x1d   :  { %p506_p0 = por %p505_p13, %p504_p12 }
  0x1f   :  { %p507_p1 = pnand %p506_p0, %p500_p11 }
  0x21   :  { %510 = shalt.err (!%p507_p1)
}
  0x22   :  { %24 = dma.hbm_to_vmem [thread:$0]  %s723_s0, 128, %s22_s24, [#allocation3]  }
  0x23   :  { %s587_s20 = smov [#allocation7]   ;;  %s511_s25 = scalar_lea.hbm %s725_s2, 256 }
  0x24   :  { %s40_s21 = sshll.u32 %s587_s20, 4  ;;  %p512_p2 = scmp.ne.s32.totalorder %s725_s2, %s511_s25  ;;  %s41_s21 = int_to_ptr.vmem [resolvable:$true] %s40_s21 }
  0x25   :  { %p515_p3 = scmp.lt.u32.totalorder %s511_s25, %s725_s2 }
  0x27   :  { %p517_p4 = pnand %p515_p3, %p512_p2 }
  0x29   :  { %520 = shalt.err (!%p517_p4)
}
  0x2a   :  { %s521_s30 = scalar_lea.vmem %s41_s21, 256  ;;  %p526_p6 = scmp.lt.s32.totalorder %s41_s21, %s41_s21 }
  0x2b   :  { %p522_p5 = scmp.ne.s32.totalorder %s41_s21, %s521_s30  ;;  %p527_p7 = scmp.lt.s32.totalorder %s521_s30, %s521_s30 }
  0x2d   :  { %p528_p8 = por %p527_p7, %p526_p6 }
  0x2f   :  { %p529_p9 = pnand %p528_p8, %p522_p5 }
  0x31   :  { %532 = shalt.err (!%p529_p9)
}
  0x32   :  { %s588_s0 = smov 128   ;;  %s589_s24 = smov 8  }
  0x33   :  { %46 = dma.hbm_to_vmem [thread:$0]  %s725_s2, 256, %s41_s21, [#allocation6], %s588_s0, %s588_s0, %s589_s24  }
  0x34   :  { %s590_s9 = smov [#allocation8]   ;;  %s533_s13 = scalar_lea.hbm %s726_s3, 1024 }
  0x35   :  { %s52_s10 = sshll.u32 %s590_s9, 4  ;;  %p534_p10 = scmp.ne.s32.totalorder %s726_s3, %s533_s13  ;;  %s53_s10 = int_to_ptr.vmem [resolvable:$true] %s52_s10 }
  0x36   :  { %p537_p11 = scmp.lt.u32.totalorder %s533_s13, %s726_s3 }
  0x38   :  { %p539_p12 = pnand %p537_p11, %p534_p10 }
  0x3a   :  { %542 = shalt.err (!%p539_p12)
}
  0x3b   :  { %s543_s18 = scalar_lea.vmem %s53_s10, 1024  ;;  %p548_p0 = scmp.lt.s32.totalorder %s53_s10, %s53_s10 }
  0x3c   :  { %p544_p13 = scmp.ne.s32.totalorder %s53_s10, %s543_s18  ;;  %p549_p1 = scmp.lt.s32.totalorder %s543_s18, %s543_s18 }
  0x3e   :  { %p550_p2 = por %p549_p1, %p548_p0 }
  0x40   :  { %p551_p3 = pnand %p550_p2, %p544_p13 }
  0x42   :  { %554 = shalt.err (!%p551_p3)
}
  0x43   :  { %58 = dma.hbm_to_vmem [thread:$0]  %s726_s3, 1024, %s53_s10, [#allocation9], %s588_s0, %s588_s0, %s589_s24  }
  0x44   :  { %577 = dma.done.wait [#allocation3], 128  }
  0x45   :  { %578 = vsyncadd [#allocation3], 4294967168 }
  0x46   :  { %579 = dma.done.wait [#allocation6], 384  }
  0x47   :  { %580 = vsyncadd [#allocation6], 4294966912 }
  0x48   :  { %581 = dma.done.wait [#allocation9], 1024  }
  0x49   :  { %582 = vsyncadd [#allocation9], 4294966272  ;;  %v591_v0 = vmov 0.0|0.0   ;;  %vm592_vm0 = vmmov 0   ;;  %v593_v1 = vmov 0.0   ;;  %v153_v2 = vld [vmem:[#allocation8] sm:$0xff]  ;;  %v248_v33 = vlaneseq }
  0x4a   :  { %430 = vmatprep.subr.bf16.mxu1 %v591_v0  ;;  %424 = vmatprep.mubr.msk.f32.mxu1 %vm592_vm0, %v593_v1  ;;  %v154_v3 = vld [vmem:[#allocation8 + $0x8] sm:$0xff]  ;;  %v155_v4 = vld [vmem:[#allocation8 + $0x10] sm:$0xff]  ;;  %v156_v6 = vld [vmem:[#allocation8 + $0x18] sm:$0xff]  ;;  %vm79_vm1 = vcmask 130048   ;;  %vm161_vm2 = vcmask 523264   ;;  %s594_s3 = smov 96  }
  0x4b   :  { %427 = vmatprep.subr.bf16.mxu0 %v591_v0  ;;  %405 = vmatprep.mubr.msk.f32.mxu0 %vm592_vm0, %v593_v1  ;;  %v431_v5 = vpack.c.bf16 %v154_v3, %v153_v2  ;;  %v434_v7 = vpack.c.bf16 %v156_v6, %v155_v4  ;;  %v77_v8 = vld [vmem:[#allocation7] sm:$0xff]  ;;  %v78_v9 = vld [vmem:[#allocation7 + $0x8] sm:$0xff]  ;;  %v157_v10 = vld [vmem:[#allocation8 + $0x20] sm:$0xff]  ;;  %v686_v37 = vshrl.u32 %v248_v33, 7  ;;  %s595_s21 = smov 32   ;;  %vm327_vm3 = vcmask 261120  }
  0x4c   :  { %v158_v11 = vld [vmem:[#allocation8 + $0x28] sm:$0xff]  ;;  %v428_v12 = vpack.c.bf16 %v78_v9, %v77_v8  ;;  %v76_v13 = vld [vmem:[#allocation2] sm:$0xff]  ;;  %v159_v15 = vld [vmem:[#allocation8 + $0x30] sm:$0xff] }
  0x4d   :  { %432 = vmatpush3.bf16.msra.mxu1 %v431_v5  ;;  %v437_v14 = vpack.c.bf16 %v158_v11, %v157_v10  ;;  %v160_v16 = vld [vmem:[#allocation8 + $0x38] sm:$0xff]  ;;  %v681_v18 = vld [vmem:[#allocation5] sm:$0xff]  ;;  %v271_v39 = vsub.s32 2, %v686_v37  ;;  %v235_v40 = vld [vmem:[%s727_s4] sm:$0xf]  ;;  %v276_v41 = vsub.s32 3, %v686_v37 }
  0x4e   :  { %433 = vmatprep.subr.bf16.mxu1 %v591_v0  ;;  %429 = vmatpush3.bf16.msra.mxu0 %v428_v12  ;;  %v440_v17 = vpack.c.bf16 %v160_v16, %v159_v15  ;;  %v250_v42 = vsub.s32 0, %v686_v37  ;;  %v255_v45 = vsub.s32 1, %v686_v37  ;;  %s596_s4 = smov 64   ;;  %v322_v15 = vld [vmem:[%s728_s5] sm:$0x3]  ;;  %s597_s5 = smov [#allocation10]  }
  0x4f   :  { %v272_v43 = vrot.slane %v235_v40, %v271_v39  ;;  %v277_v47 = vrot.slane %v235_v40, %v276_v41  ;;  %s375_s25 = sshll.u32 %s597_s5, 4  ;;  %s376_s25 = int_to_ptr.vmem [resolvable:$true] %s375_s25 }
  0x50   :  { %v251_v48 = vrot.slane %v235_v40, %v250_v42  ;;  %v256_v51 = vrot.slane %v235_v40, %v255_v45  ;;  %v349_v16 = vrot.slane %v322_v15, %v250_v42  ;;  %s555_s26 = scalar_lea.vmem %s376_s25, 128  ;;  %p560_p5 = scmp.lt.s32.totalorder %s376_s25, %s376_s25 }
  0x51   :  { %435 = vmatpush3.bf16.msra.mxu1 %v434_v7  ;;  %406 = vmatmul.mubr.msk.f32.vlgmr.msra.gmra.mrb[0].mxu0 %vm79_vm1, %v76_v13  ;;  %p556_p4 = scmp.ne.s32.totalorder %s376_s25, %s555_s26  ;;  %p561_p6 = scmp.lt.s32.totalorder %s555_s26, %s555_s26 }
  0x52   :  { %436 = vmatprep.subr.bf16.mxu1 %v591_v0 }
  0x53   :  { %p562_p7 = por %p561_p6, %p560_p5 }
  0x55   :  { %438 = vmatpush3.bf16.msra.mxu1 %v437_v14  ;;  %p563_p8 = pnand %p562_p7, %p556_p4 }
  0x56   :  { %439 = vmatprep.subr.bf16.mxu1 %v591_v0 }
  0x59   :  { %441 = vmatpush3.bf16.msra.mxu1 %v440_v17 }
  0x5c   :  { %425 = vmatmul.mubr.msk.f32.vlgmr.msra.gmra.mrb[0].mxu1 %vm161_vm2, %v681_v18 }
 0x124   :  { %v149_v19 = vpop.f32.mrb[0].mxu0 }
 0x125   :  { %v407_v20 = vpop.f32.mrb[1].mxu0 }
 0x12f   :  { %v231_v21 = vpop.f32.mrb[0].mxu1 }
 0x130   :  { %258 = vadd.xlane.f32.xlu0 %v231_v21  ;;  %v426_v22 = vpop.f32.mrb[1].mxu1 }
 0x134   :  { %236 = vadd.xlane.f32.xlu0 %v149_v19 }
 0x1bd   :  { %v259_v23 = vpop.xlane.xlu0 %258 }
 0x1be   :  { %v260_v24 = vmul.f32 0.0078125, %v259_v23  ;;  %v358_v23 = vrot.slane %v322_v15, %v255_v45 }
 0x1c0   :  { %v261_v25 = vsub.f32 %v231_v21, %v260_v24 }
 0x1c1   :  { %v237_v26 = vpop.xlane.xlu0 %236 }
 0x1c2   :  { %v239_v27 = vmul.f32 0.0078125, %v237_v26  ;;  %v262_v28 = vmul.f32 %v261_v25, %v261_v25 }
 0x1c4   :  { %v240_v29 = vsub.f32 %v149_v19, %v239_v27  ;;  %263 = vadd.xlane.f32.xlu1 %v262_v28 }
 0x1c6   :  { %v241_v30 = vmul.f32 %v240_v29, %v240_v29 }
 0x1c8   :  { %242 = vadd.xlane.f32.xlu1 %v241_v30 }
 0x1d9   :  { %297 = vrot.lane.b32.xlu1 %v681_v18, %s594_s3 }
 0x251   :  { %v264_v31 = vpop.xlane.xlu1 %263 }
 0x252   :  { %v265_v32 = vmul.f32 0.0078125, %v264_v31 }
 0x254   :  { %v266_v34 = vadd.f32 1e-05, %v265_v32 }
 0x255   :  { %v243_v35 = vpop.xlane.xlu1 %242 }
 0x256   :  { %455 = vrsqrt.f32 %v266_v34  ;;  %v244_v36 = vmul.f32 0.0078125, %v243_v35 }
 0x258   :  { %v245_v38 = vadd.f32 1e-05, %v244_v36 }
 0x259   :  { %v298_v62 = vpop.permute.xlu1 %297 }
 0x25a   :  { %457 = vrsqrt.f32 %v245_v38  ;;  %v300_v0 = vsub.f32 %v681_v18, %v298_v62 }
 0x260   :  { %v456_v44 = vpop.eup %455 }
 0x261   :  { %v268_v46 = vmul.f32 %v456_v44, %v261_v25 }
 0x263   :  { %v273_v49 = vmul.f32 %v272_v43, %v268_v46 }
 0x264   :  { %v458_v50 = vpop.eup %457 }
 0x265   :  { %v278_v52 = vadd.f32 %v277_v47, %v273_v49  ;;  %v247_v53 = vmul.f32 %v458_v50, %v240_v29 }
 0x267   :  { %287 = vrot.lane.b32.xlu0 %v278_v52, %s595_s21  ;;  %v252_v54 = vmul.f32 %v251_v48, %v247_v53 }
 0x269   :  { %v257_v55 = vadd.f32 %v256_v51, %v252_v54 }
 0x26b   :  { %v279_v56 = vadd.f32 %v278_v52, %v257_v55 }
 0x26d   :  { %v388_v57 = vmul.f32 -1.442695, %v279_v56 }
 0x26f   :  { %459 = vpow2.f32 %v388_v57 }
 0x279   :  { %v460_v58 = vpop.eup %459 }
 0x27a   :  { %v283_v59 = vadd.f32 1.0, %v460_v58 }
 0x27c   :  { %461 = vrcp.f32 %v283_v59 }
 0x286   :  { %v462_v60 = vpop.eup %461 }
 0x2d9   :  { %v288_v61 = vpop.permute.xlu0 %287 }
 0x2da   :  { %v290_v63 = vmul.f32 %v462_v60, %v288_v61 }
 0x2dc   :  { %292 = vrot.lane.b32.xlu1 %v290_v63, %s594_s3 }
 0x2e0   :  { %302 = vrot.lane.b32.xlu1 %v300_v0, %s596_s4 }
 0x34e   :  { %v293_v1 = vpop.permute.xlu1 %292 }
 0x34f   :  { %v295_v2 = vsub.f32 %v279_v56, %v293_v1 }
 0x351   :  { %463 = vtanh.f32 %v295_v2 }
 0x352   :  { %v303_v3 = vpop.permute.xlu1 %302 }
 0x353   :  { %v305_v4 = vmul.f32 %v462_v60, %v303_v3 }
 0x355   :  { %307 = vrot.lane.b32.xlu0 %v305_v4, %s594_s3 }
 0x35b   :  { %v464_v5 = vpop.eup %463 }
 0x35c   :  { %312 = vrot.lane.b32.xlu1 %v464_v5, %s596_s4 }
 0x3c7   :  { %v308_v6 = vpop.permute.xlu0 %307 }
 0x3c8   :  { %v310_v7 = vadd.f32 %v308_v6, %v681_v18 }
 0x3ce   :  { %v313_v8 = vpop.permute.xlu1 %312 }
 0x3cf   :  { %v315_v9 = vsub.f32 %v310_v7, %v313_v8 }
 0x3d1   :  { %v316_v10 = vmul.f32 %v462_v60, %v315_v9 }
 0x3d3   :  { %318 = vrot.lane.b32.xlu0 %v316_v10, %s596_s4 }
 0x445   :  { %v319_v11 = vpop.permute.xlu0 %318 }
 0x446   :  { %v321_v12 = vadd.f32 %v464_v5, %v319_v11 }
 0x448   :  { %324 = vrot.lane.b32.xlu1 %v321_v12, %s595_s21 }
 0x4ba   :  { %v325_v13 = vpop.permute.xlu1 %324 }
 0x4bb   :  { %v328_v14 = vsel %vm327_vm3, %v325_v13, 0.0 }
 0x4bc   :  { %329 = vadd.xlane.f32.xlu0 %v328_v14 }
 0x4d2   :  { %351 = vrot.lane.b32.xlu0 %v349_v16, %s594_s3 }
 0x549   :  { %v330_v17 = vpop.xlane.xlu0 %329 }
 0x54a   :  { %v332_v18 = vmul.f32 0.03125, %v330_v17 }
 0x54c   :  { %v333_v19 = vsub.f32 %v321_v12, %v332_v18 }
 0x54d   :  { %v352_v28 = vpop.permute.xlu0 %351 }
 0x54e   :  { %v334_v20 = vmul.f32 %v333_v19, %v333_v19 }
 0x550   :  { %336 = vrot.lane.b32.xlu1 %v334_v20, %s595_s21 }
 0x5c2   :  { %v337_v21 = vpop.permute.xlu1 %336 }
 0x5c3   :  { %v339_v22 = vsel %vm327_vm3, %v337_v21, 0.0 }
 0x5c4   :  { %340 = vadd.xlane.f32.xlu1 %v339_v22 }
 0x5d5   :  { %360 = vrot.lane.b32.xlu1 %v358_v23, %s594_s3 }
 0x651   :  { %v341_v24 = vpop.xlane.xlu1 %340 }
 0x652   :  { %v342_v25 = vmul.f32 0.03125, %v341_v24 }
 0x654   :  { %v343_v26 = vadd.f32 1e-05, %v342_v25 }
 0x655   :  { %v361_v30 = vpop.permute.xlu1 %360 }
 0x656   :  { %465 = vrsqrt.f32 %v343_v26 }
 0x660   :  { %v466_v27 = vpop.eup %465 }
 0x661   :  { %v345_v29 = vmul.f32 %v466_v27, %v333_v19 }
 0x663   :  { %v354_v31 = vmul.f32 %v352_v28, %v345_v29 }
 0x665   :  { %v363_v32 = vadd.f32 %v361_v30, %v354_v31 }
 0x667   :  { %365 = vrot.lane.b32.xlu0 %v363_v32, %s595_s21 }
 0x6d9   :  { %v366_v33 = vpop.permute.xlu0 %365 }
 0x6da   :  { %368 = vst.msk [vmem:[#allocation10] sm:$0xff] %vm327_vm3, %v366_v33 }
 0x6db   :  { %566 = shalt.err (!%p563_p8)
}
 0x6dc   :  { %s567_s29 = scalar_lea.hbm %s729_s6, 128 }
 0x6dd   :  { %p568_p9 = scmp.ne.s32.totalorder %s729_s6, %s567_s29  ;;  %p571_p10 = scmp.lt.u32.totalorder %s567_s29, %s729_s6 }
 0x6df   :  { %p573_p11 = pnand %p571_p10, %p568_p9 }
 0x6e1   :  { %576 = shalt.err (!%p573_p11)
}
 0x6e2   :  { %378 = dma.vmem_to_hbm [thread:$0]  %s376_s25, 128, %s729_s6, [#allocation4]  }
 0x6e3   :  { %583 = dma.done.wait [#allocation4], 128  }
 0x6e4   :  { %584 = vsyncadd [#allocation4], 4294967168 }
 0x6e5   :  { %382 = vsyncpa [#allocation3], 1 }
 0x6e6   :  { %383 = vsyncpa [#allocation6], 1 }
 0x6e7   :  { %384 = vsyncpa [#allocation9], 1 }
 0x6e8   :  { %385 = vsyncpa [#allocation4], 1 }

</bundles_post_ra>
